<compile_context>
chip_gen: v6e
topology: v6e:2x2x1
jax: 0.10.0
libtpu: 0.0.40
codegen_flags: <defaults>
</compile_context>

<pallas_src>
import jax
import jax.numpy as jnp
from jax.experimental import pallas as pl
from jax.experimental.pallas import tpu as pltpu


def critic_kernel(xT_ref, w1t_ref, b1_ref, w2_ref, b2_ref, out_ref):
    # xT_ref : (S, TM)  state tile, batch on lanes
    # w1t_ref: (H, S)   fc1 weight (PyTorch (out,in) layout), grid-resident
    # b1_ref : (H, 1)   fc1 bias
    # w2_ref : (H, 1)   fc_critic weight
    # b2_ref : (1, 1)   fc_critic bias
    # out_ref: (1, TM)  value estimates, lane-dense
    xT = xT_ref[...]
    w1t = w1t_ref[...]
    S = xT.shape[0]

    # fc1: hT[j, b] = b1[j] + sum_k w1[j, k] * x[b, k]
    # K is small & static -> unrolled broadcast-FMA on the VPU (MXU would be <2% occupied).
    hT = w1t[:, 0:1] * xT[0:1, :]
    for k in range(1, S):
        hT = hT + w1t[:, k:k + 1] * xT[k:k + 1, :]
    hT = jnp.maximum(hT + b1_ref[...], 0.0)                    # ReLU, (H, TM)

    # fc_critic: N=1 -> elementwise multiply + cross-sublane reduction (VPU + XLU).
    vT = jnp.sum(hT * w2_ref[...], axis=0, keepdims=True)      # (1, TM)
    out_ref[...] = vT + b2_ref[...]


@jax.jit
def critic_forward(state, w1t, b1, w2, b2):
    """state: (B, n_states) f32 -> (B, 1) value estimates (PyTorch CriticNet.forward)."""
    B, S = state.shape
    H = w1t.shape[0]

    # Lane-dense layout: batch on the lane (last) axis.
    xT = state.T  # (S, B)

    # Batch tile: whole batch when small / not 128-aligned (block == full dims is
    # always legal); otherwise >=128-wide lane tiles so the (8,128) constraint holds
    # and the per-step pipeline overhead amortizes.  A 512-wide f32 tile is ~16 KiB
    # double-buffered — far under even v7x's 32 MiB scoped-VMEM budget.
    if B % 128 == 0:
        TM = min(512, B)
        while B % TM:
            TM //= 2
    else:
        TM = B
    grid = (B // TM,)

    out = pl.pallas_call(
        critic_kernel,
        out_shape=jax.ShapeDtypeStruct((1, B), jnp.float32),
        grid=grid,
        in_specs=[
            pl.BlockSpec((S, TM), lambda i: (0, i)),   # state tile marches along batch
            pl.BlockSpec((H, S), lambda i: (0, 0)),    # weights/biases stay VMEM-resident
            pl.BlockSpec((H, 1), lambda i: (0, 0)),
            pl.BlockSpec((H, 1), lambda i: (0, 0)),
            pl.BlockSpec((1, 1), lambda i: (0, 0)),
        ],
        out_specs=pl.BlockSpec((1, TM), lambda i: (0, i)),
        compiler_params=pltpu.CompilerParams(
            # Batch axis is embarrassingly parallel -> sharded across both
            # TensorCores on v7x; harmless on single-TC v5e/v6e.
            dimension_semantics=("parallel",),
        ),
    )(xT, w1t, b1, w2, b2)

    return out.T  # (B, 1), PyTorch convention


def init_params(key, n_states, n_hid_1):
    # PyTorch nn.Linear default init: U(-1/sqrt(fan_in), +1/sqrt(fan_in)).
    # w1t uses PyTorch's native (out_features, in_features) layout.
    # NOTE: for production, pad n_hid_1 to 128 (or pack several critics along
    # lanes) so every vreg op does useful work.
    k1, k2, k3, k4 = jax.random.split(key, 4)
    bound1 = 1.0 / jnp.sqrt(jnp.float32(n_states))
    bound2 = 1.0 / jnp.sqrt(jnp.float32(n_hid_1))
    w1t = jax.random.uniform(k1, (n_hid_1, n_states), jnp.float32, -bound1, bound1)
    b1 = jax.random.uniform(k2, (n_hid_1, 1), jnp.float32, -bound1, bound1)
    w2 = jax.random.uniform(k3, (n_hid_1, 1), jnp.float32, -bound2, bound2)
    b2 = jax.random.uniform(k4, (1, 1), jnp.float32, -bound2, bound2)
    return w1t, b1, w2, b2


if __name__ == "__main__":
    # LunarLander-like dims: n_states=8, hidden=32, batch=4.
    B, n_states, n_hid_1 = 4, 8, 32
    key = jax.random.PRNGKey(0)
    kx, kp = jax.random.split(key)
    state = jax.random.normal(kx, (B, n_states), jnp.float32)
    w1t, b1, w2, b2 = init_params(kp, n_states, n_hid_1)

    value_est = jax.block_until_ready(critic_forward(state, w1t, b1, w2, b2))

    # Pure-JAX reference: relu(state @ W1.T + b1) @ W2 + b2
    ref = jnp.maximum(state @ w1t.T + b1.T, 0.0) @ w2 + b2
    assert value_est.shape == (B, 1)
    assert jnp.allclose(value_est, ref, atol=1e-5), "mismatch vs reference (small B)"

    # Exercise the gridded / lane-tiled path with a large, 128-aligned batch.
    B2 = 1024
    state2 = jax.random.normal(jax.random.PRNGKey(1), (B2, n_states), jnp.float32)
    value_est2 = jax.block_until_ready(critic_forward(state2, w1t, b1, w2, b2))
    ref2 = jnp.maximum(state2 @ w1t.T + b1.T, 0.0) @ w2 + b2
    assert value_est2.shape == (B2, 1)
    assert jnp.allclose(value_est2, ref2, atol=1e-5), "mismatch vs reference (large B)"

    print("KERNEL_OK")
</pallas_src>

<mosaic_0001>
module attributes {stable_mosaic.version = 11 : i64} {
  func.func @critic_kernel(%arg0: i32, %arg1: memref<8x4xf32, #tpu.memory_space<vmem>>, %arg2: memref<32x8xf32, #tpu.memory_space<vmem>>, %arg3: memref<32x1xf32, #tpu.memory_space<vmem>>, %arg4: memref<32x1xf32, #tpu.memory_space<vmem>>, %arg5: memref<1x1xf32, #tpu.memory_space<vmem>>, %arg6: memref<1x4xf32, #tpu.memory_space<vmem>>) attributes {dimension_semantics = [#tpu.dimension_semantics<parallel>], iteration_bounds = array<i64: 1>, scalar_prefetch = 0 : i64, scratch_operands = 0 : i64, tpu.core_type = #tpu.core_type<tc>, window_params = [{transform_indices = @transform_0, window_bounds = array<i64: 8, 4>}, {pipeline_mode = #tpu.pipeline_mode<synchronous>, transform_indices = @transform_1, window_bounds = array<i64: 32, 8>}, {pipeline_mode = #tpu.pipeline_mode<synchronous>, transform_indices = @transform_2, window_bounds = array<i64: 32, 1>}, {pipeline_mode = #tpu.pipeline_mode<synchronous>, transform_indices = @transform_3, window_bounds = array<i64: 32, 1>}, {pipeline_mode = #tpu.pipeline_mode<synchronous>, transform_indices = @transform_4, window_bounds = array<i64: 1, 1>}, {transform_indices = @transform_5, window_bounds = array<i64: 1, 4>}]} {
    %c0 = arith.constant 0 : index
    %c0_0 = arith.constant 0 : index
    %0 = vector.load %arg1[%c0, %c0_0] : memref<8x4xf32, #tpu.memory_space<vmem>>, vector<8x4xf32>
    %c0_1 = arith.constant 0 : index
    %c0_2 = arith.constant 0 : index
    %1 = vector.load %arg2[%c0_1, %c0_2] : memref<32x8xf32, #tpu.memory_space<vmem>>, vector<32x8xf32>
    %2 = vector.extract_strided_slice %1 {offsets = [0, 0], sizes = [32, 1], strides = [1, 1]} : vector<32x8xf32> to vector<32x1xf32>
    %3 = vector.extract_strided_slice %0 {offsets = [0, 0], sizes = [1, 4], strides = [1, 1]} : vector<8x4xf32> to vector<1x4xf32>
    %4 = vector.broadcast %2 : vector<32x1xf32> to vector<32x4xf32>
    %5 = vector.broadcast %3 : vector<1x4xf32> to vector<32x4xf32>
    %6 = arith.mulf %4, %5 : vector<32x4xf32>
    %7 = vector.extract_strided_slice %1 {offsets = [0, 1], sizes = [32, 1], strides = [1, 1]} : vector<32x8xf32> to vector<32x1xf32>
    %8 = vector.extract_strided_slice %0 {offsets = [1, 0], sizes = [1, 4], strides = [1, 1]} : vector<8x4xf32> to vector<1x4xf32>
    %9 = vector.broadcast %7 : vector<32x1xf32> to vector<32x4xf32>
    %10 = vector.broadcast %8 : vector<1x4xf32> to vector<32x4xf32>
    %11 = arith.mulf %9, %10 : vector<32x4xf32>
    %12 = arith.addf %6, %11 : vector<32x4xf32>
    %13 = vector.extract_strided_slice %1 {offsets = [0, 2], sizes = [32, 1], strides = [1, 1]} : vector<32x8xf32> to vector<32x1xf32>
    %14 = vector.extract_strided_slice %0 {offsets = [2, 0], sizes = [1, 4], strides = [1, 1]} : vector<8x4xf32> to vector<1x4xf32>
    %15 = vector.broadcast %13 : vector<32x1xf32> to vector<32x4xf32>
    %16 = vector.broadcast %14 : vector<1x4xf32> to vector<32x4xf32>
    %17 = arith.mulf %15, %16 : vector<32x4xf32>
    %18 = arith.addf %12, %17 : vector<32x4xf32>
    %19 = vector.extract_strided_slice %1 {offsets = [0, 3], sizes = [32, 1], strides = [1, 1]} : vector<32x8xf32> to vector<32x1xf32>
    %20 = vector.extract_strided_slice %0 {offsets = [3, 0], sizes = [1, 4], strides = [1, 1]} : vector<8x4xf32> to vector<1x4xf32>
    %21 = vector.broadcast %19 : vector<32x1xf32> to vector<32x4xf32>
    %22 = vector.broadcast %20 : vector<1x4xf32> to vector<32x4xf32>
    %23 = arith.mulf %21, %22 : vector<32x4xf32>
    %24 = arith.addf %18, %23 : vector<32x4xf32>
    %25 = vector.extract_strided_slice %1 {offsets = [0, 4], sizes = [32, 1], strides = [1, 1]} : vector<32x8xf32> to vector<32x1xf32>
    %26 = vector.extract_strided_slice %0 {offsets = [4, 0], sizes = [1, 4], strides = [1, 1]} : vector<8x4xf32> to vector<1x4xf32>
    %27 = vector.broadcast %25 : vector<32x1xf32> to vector<32x4xf32>
    %28 = vector.broadcast %26 : vector<1x4xf32> to vector<32x4xf32>
    %29 = arith.mulf %27, %28 : vector<32x4xf32>
    %30 = arith.addf %24, %29 : vector<32x4xf32>
    %31 = vector.extract_strided_slice %1 {offsets = [0, 5], sizes = [32, 1], strides = [1, 1]} : vector<32x8xf32> to vector<32x1xf32>
    %32 = vector.extract_strided_slice %0 {offsets = [5, 0], sizes = [1, 4], strides = [1, 1]} : vector<8x4xf32> to vector<1x4xf32>
    %33 = vector.broadcast %31 : vector<32x1xf32> to vector<32x4xf32>
    %34 = vector.broadcast %32 : vector<1x4xf32> to vector<32x4xf32>
    %35 = arith.mulf %33, %34 : vector<32x4xf32>
    %36 = arith.addf %30, %35 : vector<32x4xf32>
    %37 = vector.extract_strided_slice %1 {offsets = [0, 6], sizes = [32, 1], strides = [1, 1]} : vector<32x8xf32> to vector<32x1xf32>
    %38 = vector.extract_strided_slice %0 {offsets = [6, 0], sizes = [1, 4], strides = [1, 1]} : vector<8x4xf32> to vector<1x4xf32>
    %39 = vector.broadcast %37 : vector<32x1xf32> to vector<32x4xf32>
    %40 = vector.broadcast %38 : vector<1x4xf32> to vector<32x4xf32>
    %41 = arith.mulf %39, %40 : vector<32x4xf32>
    %42 = arith.addf %36, %41 : vector<32x4xf32>
    %43 = vector.extract_strided_slice %1 {offsets = [0, 7], sizes = [32, 1], strides = [1, 1]} : vector<32x8xf32> to vector<32x1xf32>
    %44 = vector.extract_strided_slice %0 {offsets = [7, 0], sizes = [1, 4], strides = [1, 1]} : vector<8x4xf32> to vector<1x4xf32>
    %45 = vector.broadcast %43 : vector<32x1xf32> to vector<32x4xf32>
    %46 = vector.broadcast %44 : vector<1x4xf32> to vector<32x4xf32>
    %47 = arith.mulf %45, %46 : vector<32x4xf32>
    %48 = arith.addf %42, %47 : vector<32x4xf32>
    %c0_3 = arith.constant 0 : index
    %c0_4 = arith.constant 0 : index
    %49 = vector.load %arg3[%c0_3, %c0_4] : memref<32x1xf32, #tpu.memory_space<vmem>>, vector<32x1xf32>
    %50 = vector.broadcast %49 : vector<32x1xf32> to vector<32x4xf32>
    %51 = arith.addf %48, %50 : vector<32x4xf32>
    %cst = arith.constant 0.000000e+00 : f32
    %52 = vector.broadcast %cst : f32 to vector<32x4xf32>
    %53 = arith.maximumf %51, %52 : vector<32x4xf32>
    %c0_5 = arith.constant 0 : index
    %c0_6 = arith.constant 0 : index
    %54 = vector.load %arg4[%c0_5, %c0_6] : memref<32x1xf32, #tpu.memory_space<vmem>>, vector<32x1xf32>
    %55 = vector.broadcast %54 : vector<32x1xf32> to vector<32x4xf32>
    %56 = arith.mulf %53, %55 : vector<32x4xf32>
    %cst_7 = arith.constant dense<0.000000e+00> : vector<4xf32>
    %57 = vector.multi_reduction <add>, %56, %cst_7 [0] : vector<32x4xf32> to vector<4xf32>
    %58 = vector.shape_cast %57 : vector<4xf32> to vector<1x4xf32>
    %c0_8 = arith.constant 0 : index
    %c0_9 = arith.constant 0 : index
    %59 = vector.load %arg5[%c0_8, %c0_9] : memref<1x1xf32, #tpu.memory_space<vmem>>, vector<1x1xf32>
    %60 = vector.broadcast %59 : vector<1x1xf32> to vector<1x4xf32>
    %61 = arith.addf %58, %60 : vector<1x4xf32>
    %c0_10 = arith.constant 0 : index
    %c0_11 = arith.constant 0 : index
    %62 = vector.load %arg6[%c0_10, %c0_11] : memref<1x4xf32, #tpu.memory_space<vmem>>, vector<1x4xf32>
    tpu.vector_store %arg6[%c0_10, %c0_11], %61 {strides = array<i32>} : memref<1x4xf32, #tpu.memory_space<vmem>>, vector<1x4xf32>,
    return
  }
  func.func @transform_0(%arg0: i32) -> (i32, i32) {
    %c0_i32 = arith.constant 0 : i32
    %c0_i32_0 = arith.constant 0 : i32
    return %c0_i32, %arg0 : i32, i32
  }
  func.func @transform_1(%arg0: i32) -> (i32, i32) {
    %c0_i32 = arith.constant 0 : i32
    %c0_i32_0 = arith.constant 0 : i32
    %c0_i32_1 = arith.constant 0 : i32
    return %c0_i32, %c0_i32_0 : i32, i32
  }
  func.func @transform_2(%arg0: i32) -> (i32, i32) {
    %c0_i32 = arith.constant 0 : i32
    %c0_i32_0 = arith.constant 0 : i32
    %c0_i32_1 = arith.constant 0 : i32
    return %c0_i32, %c0_i32_0 : i32, i32
  }
  func.func @transform_3(%arg0: i32) -> (i32, i32) {
    %c0_i32 = arith.constant 0 : i32
    %c0_i32_0 = arith.constant 0 : i32
    %c0_i32_1 = arith.constant 0 : i32
    return %c0_i32, %c0_i32_0 : i32, i32
  }
  func.func @transform_4(%arg0: i32) -> (i32, i32) {
    %c0_i32 = arith.constant 0 : i32
    %c0_i32_0 = arith.constant 0 : i32
    %c0_i32_1 = arith.constant 0 : i32
    return %c0_i32, %c0_i32_0 : i32, i32
  }
  func.func @transform_5(%arg0: i32) -> (i32, i32) {
    %c0_i32 = arith.constant 0 : i32
    %c0_i32_0 = arith.constant 0 : i32
    return %c0_i32, %arg0 : i32, i32
  }
}

</mosaic_0001>

<bundles_post_ra>
// kernel: critic_forward.1
= control target key start
LH: loop header
LB: loop body
LE: loop exit
PB: predicated region body
PF: predicated region fallthrough
CT: control target
= control target key end

     0   :  { %s551_s0 = inlined_call_operand.vmem [shape: f32[8,4], index: 0, kind: input, shape index: {}]   ;;  %s552_s1 = inlined_call_operand.vmem [shape: f32[32,8], index: 1, kind: input, shape index: {}]   ;;  %s553_s2 = inlined_call_operand.vmem [shape: f32[32,1], index: 2, kind: input, shape index: {}]   ;;  %s554_s3 = inlined_call_operand.vmem [shape: f32[32,1], index: 3, kind: input, shape index: {}]   ;;  %s555_s4 = inlined_call_operand.<no memory space> [shape: f32[1,1], index: 4, kind: input, shape index: {}]   ;;  %s556_s5 = inlined_call_operand.hbm [shape: f32[1,4], index: 5, kind: output, shape index: {}]  }
   0x1   :  { %v10_v0 = vstv %s555_s4 }
   0x2   :  { %11 = vst [vmem:[#allocation2] sm:$0x1] %v10_v0 }
   0x3   :  { %v452_v1 = vld [vmem:[%s552_s1 + $0x10] sm:$0xff]  ;;  %v457_v2 = vld [vmem:[%s552_s1] sm:$0xff]  ;;  %v407_v3 = vmov 0   ;;  %v466_v4 = vld [vmem:[%s552_s1 + $0x18] sm:$0xff] }
   0x4   :  { %363 = vset.pattern.permute.xlu1 %v407_v3  ;;  %362 = vset.pattern.permute.xlu0 %v407_v3  ;;  %v25_v5 = vld [vmem:[%s552_s1 + $0x8] sm:$0xff] }
   0x5   :  { %40 = vperm.xlu1 %363, %v452_v1   ;;  %30 = vperm.xlu0 %362, %v457_v2  }
   0x6   :  { %12 = vsyncpa [#allocation4], 0  ;;  %v408_v6 = vmov 1   ;;  %v409_v7 = vmov 2   ;;  %v410_v8 = vmov 3   ;;  %v411_v9 = vmov 4  }
   0x7   :  { %v412_v10 = vmov 5   ;;  %v413_v11 = vmov 6   ;;  %v414_v12 = vmov 7   ;;  %v253_v13 = vld [vmem:[%s553_s2 + $0x8] sm:$0xff]  ;;  %v284_v14 = vld [vmem:[%s554_s3] sm:$0xff]  ;;  %v286_v15 = vld [vmem:[%s554_s3 + $0x10] sm:$0xff]  ;;  %v48_v42 = vlaneseq }
   0x8   :  { %v252_v17 = vld [vmem:[%s553_s2] sm:$0xff]  ;;  %v254_v18 = vld [vmem:[%s553_s2 + $0x10] sm:$0xff]  ;;  %v255_v19 = vld [vmem:[%s553_s2 + $0x18] sm:$0xff]  ;;  %vm312_vm0 = vcmask 31744   ;;  %vm337_vm1 = vcmask 24576  }
   0x9   :  { %45 = vperm.xlu1 %363, %v466_v4   ;;  %35 = vperm.xlu0 %362, %v25_v5   ;;  %v326_v16 = vld [vmem:[#allocation2] sm:$0x1]  ;;  %v285_v20 = vld [vmem:[%s554_s3 + $0x8] sm:$0xff]  ;;  %v287_v21 = vld [vmem:[%s554_s3 + $0x18] sm:$0xff]  ;;  %v525_v45 = vshrl.u32 %v48_v42, 7 }
   0xa   :  { %v23_v49 = vld [vmem:[%s551_s0] sm:$0xff]  ;;  %s415_s0 = smov [#allocation3]  }
   0xb   :  { %v74_v46 = vsub.s32 1, %v525_v45  ;;  %v50_v47 = vsub.s32 0, %v525_v45  ;;  %v102_v50 = vsub.s32 2, %v525_v45  ;;  %v130_v54 = vsub.s32 3, %v525_v45  ;;  %s345_s17 = sshll.u32 %s415_s0, 4  ;;  %s346_s17 = int_to_ptr.vmem [resolvable:$true] %s345_s17 }
   0xc   :  { %v158_v62 = vsub.s32 4, %v525_v45  ;;  %v186_v0 = vsub.s32 5, %v525_v45  ;;  %s385_s18 = scalar_lea.vmem %s346_s17, 16  ;;  %s389_s19 = scalar_lea.vmem %s346_s17, 32 }
   0xd   :  { %365 = vset.pattern.permute.xlu1 %v408_v6  ;;  %364 = vset.pattern.permute.xlu0 %v408_v6  ;;  %v75_v52 = vrot.slane %v23_v49, %v74_v46  ;;  %v51_v53 = vrot.slane %v23_v49, %v50_v47  ;;  %v103_v55 = vrot.slane %v23_v49, %v102_v50  ;;  %p386_p0 = scmp.ne.s32.totalorder %s346_s17, %s385_s18  ;;  %p390_p1 = scmp.lt.s32.totalorder %s346_s17, %s346_s17 }
   0xe   :  { %61 = vperm.xlu1 %365, %v25_v5   ;;  %57 = vperm.xlu0 %364, %v457_v2   ;;  %v131_v63 = vrot.slane %v23_v49, %v130_v54  ;;  %p391_p2 = scmp.lt.s32.totalorder %s389_s19, %s385_s18 }
  0x10   :  { %p392_p3 = por %p391_p2, %p390_p1 }
  0x12   :  { %65 = vperm.xlu1 %365, %v452_v1   ;;  %69 = vperm.xlu0 %364, %v466_v4   ;;  %p393_p4 = pnand %p392_p3, %p386_p0 }
  0x16   :  { %366 = vset.pattern.permute.xlu1 %v409_v7  ;;  %367 = vset.pattern.permute.xlu0 %v409_v7 }
  0x17   :  { %85 = vperm.xlu1 %366, %v457_v2   ;;  %89 = vperm.xlu0 %367, %v25_v5  }
  0x1b   :  { %93 = vperm.xlu1 %366, %v452_v1   ;;  %368 = vset.pattern.permute.xlu0 %v410_v8 }
  0x1c   :  { %113 = vperm.xlu0 %368, %v457_v2  }
  0x1f   :  { %97 = vperm.xlu1 %366, %v466_v4  }
  0x20   :  { %125 = vperm.xlu0 %368, %v466_v4  }
  0x23   :  { %369 = vset.pattern.permute.xlu1 %v410_v8 }
  0x24   :  { %117 = vperm.xlu1 %369, %v25_v5   ;;  %371 = vset.pattern.permute.xlu0 %v411_v9 }
  0x25   :  { %145 = vperm.xlu0 %371, %v25_v5  }
  0x28   :  { %121 = vperm.xlu1 %369, %v452_v1  }
  0x29   :  { %373 = vset.pattern.permute.xlu0 %v412_v10 }
  0x2a   :  { %173 = vperm.xlu0 %373, %v25_v5  }
  0x2c   :  { %370 = vset.pattern.permute.xlu1 %v411_v9 }
  0x2d   :  { %141 = vperm.xlu1 %370, %v457_v2  }
  0x2e   :  { %376 = vset.pattern.permute.xlu0 %v413_v11 }
  0x2f   :  { %197 = vperm.xlu0 %376, %v457_v2  }
  0x31   :  { %149 = vperm.xlu1 %370, %v452_v1  }
  0x33   :  { %205 = vperm.xlu0 %376, %v452_v1  }
  0x35   :  { %372 = vset.pattern.permute.xlu1 %v412_v10 }
  0x36   :  { %169 = vperm.xlu1 %372, %v457_v2  }
  0x37   :  { %380 = vset.pattern.permute.xlu0 %v414_v12 }
  0x38   :  { %229 = vperm.xlu0 %380, %v25_v5  }
  0x3a   :  { %374 = vset.pattern.permute.xlu1 %v411_v9 }
  0x3b   :  { %153 = vperm.xlu1 %374, %v466_v4  }
  0x3c   :  { %237 = vperm.xlu0 %380, %v466_v4  }
  0x3f   :  { %375 = vset.pattern.permute.xlu1 %v412_v10 }
  0x40   :  { %177 = vperm.xlu1 %375, %v452_v1   ;;  %384 = vset.pattern.permute.xlu0 %v407_v3 }
  0x41   :  { %263 = vperm.xlu0 %384, %v253_v13  }
  0x44   :  { %377 = vset.pattern.permute.xlu1 %v413_v11 }
  0x45   :  { %201 = vperm.xlu1 %377, %v25_v5   ;;  %290 = vperm.xlu0 %384, %v284_v14   ;;  %v187_v14 = vrot.slane %v23_v49, %v186_v0 }
  0x49   :  { %378 = vset.pattern.permute.xlu1 %v412_v10  ;;  %300 = vperm.xlu0 %384, %v286_v15   ;;  %v159_v10 = vrot.slane %v23_v49, %v158_v62 }
  0x4a   :  { %181 = vperm.xlu1 %378, %v466_v4  }
  0x4d   :  { %329 = vperm.xlu0 %384, %v326_v16  }
  0x4e   :  { %379 = vset.pattern.permute.xlu1 %v414_v12 }
  0x4f   :  { %225 = vperm.xlu1 %379, %v457_v2   ;;  %v214_v2 = vsub.s32 6, %v525_v45 }
  0x53   :  { %381 = vset.pattern.permute.xlu1 %v413_v11 }
  0x54   :  { %209 = vperm.xlu1 %381, %v466_v4  }
  0x58   :  { %382 = vset.pattern.permute.xlu1 %v414_v12 }
  0x59   :  { %233 = vperm.xlu1 %382, %v452_v1  }
  0x5d   :  { %383 = vset.pattern.permute.xlu1 %v407_v3 }
  0x5e   :  { %258 = vperm.xlu1 %383, %v252_v17   ;;  %v215_v17 = vrot.slane %v23_v49, %v214_v2 }
  0x62   :  { %268 = vperm.xlu1 %383, %v254_v18   ;;  %v242_v18 = vsub.s32 7, %v525_v45 }
  0x66   :  { %273 = vperm.xlu1 %383, %v255_v19  }
  0x6a   :  { %295 = vperm.xlu1 %383, %v285_v20  }
  0x6e   :  { %305 = vperm.xlu1 %383, %v287_v21  }
  0x80   :  { %v41_v22 = vpop.permute.xlu1 %40  ;;  %v31_v26 = vpop.permute.xlu0 %30 }
  0x81   :  { %v52_v58 = vmul.f32 %v51_v53, %v31_v26  ;;  %v54_v11 = vmul.f32 %v51_v53, %v41_v22 }
  0x84   :  { %v519_v23 = vpop.permute.xlu1 %45  ;;  %v36_v29 = vpop.permute.xlu0 %35 }
  0x85   :  { %v53_v60 = vmul.f32 %v51_v53, %v36_v29 }
  0x89   :  { %v62_v24 = vpop.permute.xlu1 %61  ;;  %v58_v31 = vpop.permute.xlu0 %57 }
  0x8a   :  { %v76_v59 = vmul.f32 %v75_v52, %v58_v31  ;;  %v77_v61 = vmul.f32 %v75_v52, %v62_v24 }
  0x8c   :  { %v80_v4 = vadd.f32 %v76_v59, %v52_v58  ;;  %v81_v8 = vadd.f32 %v77_v61, %v53_v60  ;;  %v243_v58 = vrot.slane %v23_v49, %v242_v18 }
  0x8d   :  { %v66_v25 = vpop.permute.xlu1 %65  ;;  %v70_v33 = vpop.permute.xlu0 %69 }
  0x8e   :  { %v78_v5 = vmul.f32 %v75_v52, %v66_v25  ;;  %v79_v15 = vmul.f32 %v75_v52, %v70_v33  ;;  %v55_v25 = vmul.f32 %v51_v53, %v519_v23 }
  0x90   :  { %v82_v19 = vadd.f32 %v78_v5, %v54_v11  ;;  %v83_v33 = vadd.f32 %v79_v15, %v55_v25 }
  0x92   :  { %v86_v27 = vpop.permute.xlu1 %85  ;;  %v90_v36 = vpop.permute.xlu0 %89 }
  0x93   :  { %v105_v1 = vmul.f32 %v103_v55, %v90_v36  ;;  %v104_v6 = vmul.f32 %v103_v55, %v86_v27 }
  0x95   :  { %v109_v16 = vadd.f32 %v105_v1, %v81_v8  ;;  %v108_v20 = vadd.f32 %v104_v6, %v80_v4 }
  0x96   :  { %v94_v28 = vpop.permute.xlu1 %93 }
  0x97   :  { %v114_v38 = vpop.permute.xlu0 %113  ;;  %v106_v12 = vmul.f32 %v103_v55, %v94_v28 }
  0x98   :  { %v132_v13 = vmul.f32 %v131_v63, %v114_v38 }
  0x99   :  { %v110_v22 = vadd.f32 %v106_v12, %v82_v19 }
  0x9a   :  { %v98_v30 = vpop.permute.xlu1 %97  ;;  %v136_v28 = vadd.f32 %v132_v13, %v108_v20 }
  0x9b   :  { %v521_v40 = vpop.permute.xlu0 %125  ;;  %v107_v26 = vmul.f32 %v103_v55, %v98_v30 }
  0x9d   :  { %v111_v54 = vadd.f32 %v107_v26, %v83_v33 }
  0x9f   :  { %v118_v32 = vpop.permute.xlu1 %117 }
  0xa0   :  { %v146_v43 = vpop.permute.xlu0 %145  ;;  %v133_v9 = vmul.f32 %v131_v63, %v118_v32 }
  0xa1   :  { %v161_v29 = vmul.f32 %v159_v10, %v146_v43 }
  0xa2   :  { %v137_v27 = vadd.f32 %v133_v9, %v109_v16 }
  0xa3   :  { %v122_v34 = vpop.permute.xlu1 %121 }
  0xa4   :  { %v134_v21 = vmul.f32 %v131_v63, %v122_v34  ;;  %v135_v34 = vmul.f32 %v131_v63, %v521_v40 }
  0xa5   :  { %v174_v51 = vpop.permute.xlu0 %173 }
  0xa6   :  { %v189_v42 = vmul.f32 %v187_v14, %v174_v51  ;;  %v138_v46 = vadd.f32 %v134_v21, %v110_v22  ;;  %v139_v62 = vadd.f32 %v135_v34, %v111_v54 }
  0xa8   :  { %v142_v35 = vpop.permute.xlu1 %141 }
  0xa9   :  { %v160_v24 = vmul.f32 %v159_v10, %v142_v35  ;;  %v165_v35 = vadd.f32 %v161_v29, %v137_v27 }
  0xaa   :  { %v198_v56 = vpop.permute.xlu0 %197 }
  0xab   :  { %v164_v50 = vadd.f32 %v160_v24, %v136_v28  ;;  %v216_v53 = vmul.f32 %v215_v17, %v198_v56  ;;  %v193_v59 = vadd.f32 %v189_v42, %v165_v35 }
  0xac   :  { %v150_v37 = vpop.permute.xlu1 %149 }
  0xad   :  { %v162_v36 = vmul.f32 %v159_v10, %v150_v37 }
  0xae   :  { %v206_v3 = vpop.permute.xlu0 %205 }
  0xaf   :  { %v166_v23 = vadd.f32 %v162_v36, %v138_v46 }
  0xb1   :  { %v170_v39 = vpop.permute.xlu1 %169 }
  0xb2   :  { %v188_v38 = vmul.f32 %v187_v14, %v170_v39  ;;  %v218_v39 = vmul.f32 %v215_v17, %v206_v3 }
  0xb3   :  { %v230_v31 = vpop.permute.xlu0 %229 }
  0xb4   :  { %v192_v30 = vadd.f32 %v188_v38, %v164_v50  ;;  %v245_v0 = vmul.f32 %v243_v58, %v230_v31 }
  0xb6   :  { %v523_v41 = vpop.permute.xlu1 %153 }
  0xb7   :  { %v238_v60 = vpop.permute.xlu0 %237  ;;  %v163_v37 = vmul.f32 %v159_v10, %v523_v41 }
  0xb8   :  { %v247_v10 = vmul.f32 %v243_v58, %v238_v60 }
  0xb9   :  { %v167_v2 = vadd.f32 %v163_v37, %v139_v62 }
  0xbb   :  { %v178_v44 = vpop.permute.xlu1 %177 }
  0xbc   :  { %v190_v52 = vmul.f32 %v187_v14, %v178_v44  ;;  %v220_v44 = vadd.f32 %v216_v53, %v192_v30  ;;  %v264_v5 = vpop.permute.xlu0 %263 }
  0xbe   :  { %v194_v61 = vadd.f32 %v190_v52, %v166_v23 }
  0xc0   :  { %v202_v48 = vpop.permute.xlu1 %201  ;;  %v291_v12 = vpop.permute.xlu0 %290 }
  0xc1   :  { %v217_v43 = vmul.f32 %v215_v17, %v202_v48  ;;  %v222_v48 = vadd.f32 %v218_v39, %v194_v61 }
  0xc3   :  { %v221_v1 = vadd.f32 %v217_v43, %v193_v59 }
  0xc4   :  { %v301_v20 = vpop.permute.xlu0 %300 }
  0xc5   :  { %v536_v57 = vpop.permute.xlu1 %181  ;;  %v249_v8 = vadd.f32 %v245_v0, %v221_v1 }
  0xc6   :  { %v191_v40 = vmul.f32 %v187_v14, %v536_v57 }
  0xc7   :  { %v277_v13 = vadd.f32 %v264_v5, %v249_v8 }
  0xc8   :  { %v195_v6 = vadd.f32 %v191_v40, %v167_v2  ;;  %v330_v54 = vpop.permute.xlu0 %329 }
  0xc9   :  { %v281_v18 = vmax.f32 %v277_v13, 0.0  ;;  %v335_v35 = vrot.slane %v330_v54, %v50_v47 }
  0xca   :  { %v226_v7 = vpop.permute.xlu1 %225 }
  0xcb   :  { %v244_v51 = vmul.f32 %v243_v58, %v226_v7 }
  0xcd   :  { %v248_v56 = vadd.f32 %v244_v51, %v220_v44 }
  0xcf   :  { %v210_v32 = vpop.permute.xlu1 %209 }
  0xd0   :  { %v219_v4 = vmul.f32 %v215_v17, %v210_v32 }
  0xd2   :  { %v223_v7 = vadd.f32 %v219_v4, %v195_v6 }
  0xd4   :  { %v234_v55 = vpop.permute.xlu1 %233  ;;  %v251_v14 = vadd.f32 %v247_v10, %v223_v7 }
  0xd5   :  { %v246_v63 = vmul.f32 %v243_v58, %v234_v55 }
  0xd7   :  { %v250_v41 = vadd.f32 %v246_v63, %v222_v48 }
  0xd9   :  { %v259_v49 = vpop.permute.xlu1 %258 }
  0xda   :  { %v276_v9 = vadd.f32 %v259_v49, %v248_v56 }
  0xdc   :  { %v280_v15 = vmax.f32 %v276_v9, 0.0 }
  0xdd   :  { %v269_v3 = vpop.permute.xlu1 %268 }
  0xde   :  { %v278_v11 = vadd.f32 %v269_v3, %v250_v41  ;;  %v308_v19 = vmul.f32 %v291_v12, %v280_v15 }
  0xe0   :  { %v282_v57 = vmax.f32 %v278_v11, 0.0  ;;  %v313_v27 = vsel %vm312_vm0, %v308_v19, 0.0 }
  0xe1   :  { %v274_v16 = vpop.permute.xlu1 %273 }
  0xe2   :  { %v279_v17 = vadd.f32 %v274_v16, %v251_v14  ;;  %v310_v24 = vmul.f32 %v301_v20, %v282_v57 }
  0xe4   :  { %v283_v26 = vmax.f32 %v279_v17, 0.0  ;;  %v316_v22 = vsel %vm312_vm0, %v310_v24, 0.0 }
  0xe5   :  { %v296_v21 = vpop.permute.xlu1 %295 }
  0xe6   :  { %v309_v25 = vmul.f32 %v296_v21, %v281_v18 }
  0xe8   :  { %v314_v29 = vsel %vm312_vm0, %v309_v25, 0.0 }
  0xe9   :  { %v315_v31 = vadd.f32 %v314_v29, %v313_v27  ;;  %v306_v32 = vpop.permute.xlu1 %305 }
  0xea   :  { %v311_v28 = vmul.f32 %v306_v32, %v283_v26 }
  0xeb   :  { %v317_v36 = vadd.f32 %v316_v22, %v315_v31 }
  0xec   :  { %v318_v38 = vsel %vm312_vm0, %v311_v28, 0.0 }
  0xed   :  { %v319_v33 = vadd.f32 %v318_v38, %v317_v36 }
  0xef   :  { %v320_v42 = vrot.slane %v319_v33, 4 }
  0xf1   :  { %v321_v46 = vadd.f32 %v320_v42, %v319_v33 }
  0xf3   :  { %v322_v50 = vrot.slane %v321_v46, 2 }
  0xf5   :  { %v323_v52 = vadd.f32 %v322_v50, %v321_v46 }
  0xf7   :  { %v324_v34 = vrot.slane %v323_v52, 1 }
  0xf9   :  { %v325_v58 = vadd.f32 %v324_v34, %v323_v52 }
  0xfb   :  { %v336_v23 = vadd.f32 %v335_v35, %v325_v58 }
  0xfd   :  { %338 = vst.msk [vmem:[#allocation3] sm:$0x1] %vm337_vm1, %v336_v23 }
  0xfe   :  { %396 = shalt.err (!%p393_p4)
}
  0xff   :  { %348 = dma.vmem_to_hbm [thread:$0]  %s346_s17, 16, %s556_s5, [#allocation4]  }
 0x100   :  { %405 = dma.done.wait [#allocation4], 16  }
 0x101   :  { %406 = vsyncadd [#allocation4], 4294967280 }
 0x102   :  { %352 = vsyncpa [#allocation4], 1 }

</bundles_post_ra>
